<compile_context>
chip_gen: v6e
topology: v6e:2x2x1
jax: 0.10.0
libtpu: 0.0.40
codegen_flags: <defaults>
</compile_context>

<pallas_src>
import functools

import jax
import jax.numpy as jnp
from jax import lax
from jax.experimental import pallas as pl
from jax.experimental.pallas import tpu as pltpu  # noqa: F401  (TPU backend)


def _fused_double_linear_kernel(xf_ref, k_ref, c_ref, o_ref):
    # xf_ref: (B, N*D)      flattened inputs
    # k_ref:  (F*F, N*D)    collapsed weight  K[i*F+j, n*D+d] = W[i,d]*W[j,n]
    # c_ref:  (1, F*F)      folded bias       C[i*F+j] = b[i]*rowsum(W)[j] + b[j]
    # o_ref:  (B, F*F)      flattened output, reshaped to (B, F, F) outside
    o = lax.dot_general(
        xf_ref[...], k_ref[...], (((1,), (1,)), ((), ())),
        preferred_element_type=jnp.float32,
    )                                           # (B, F*F) — single MXU push
    o_ref[...] = (o + c_ref[...]).astype(o_ref.dtype)   # one full-block store


def prepare_params(w, b):
    """Hoisted out of the per-call path: W/b are static module parameters."""
    f_out, f_in = w.shape
    # K[i*F+j, n*D+d] = W[i,d] * W[j,n]
    k = jnp.einsum("id,jn->ijnd", w, w).reshape(f_out * f_out, f_in * f_in)
    # C[i*F+j] = b[i]*rowsum(W)[j] + b[j]
    c = (b[:, None] * jnp.sum(w, axis=1)[None, :] + b[None, :]).reshape(
        1, f_out * f_out
    )
    return k, c


def double_linear_permute(x, w, b, k, c):
    """linear(permute(linear(x, W, b), (0, 2, 1)), W, b) — matches the PyTorch Model."""
    B, N, D = x.shape
    f_out, f_in = w.shape
    assert D == f_in, "first linear requires D == in_features"
    assert N == f_in, "second matmul requires N == in_features"

    x_flat = x.reshape(B, N * D)

    flops = 2 * B * (f_out * f_out) * (N * D)
    bytes_accessed = 4 * (x_flat.size + k.size + c.size + B * f_out * f_out)

    out_flat = pl.pallas_call(
        _fused_double_linear_kernel,
        out_shape=jax.ShapeDtypeStruct((B, f_out * f_out), x.dtype),
        cost_estimate=pl.CostEstimate(
            flops=flops, transcendentals=0, bytes_accessed=bytes_accessed
        ),
    )(x_flat, k, c)

    return out_flat.reshape(B, f_out, f_out)


if __name__ == "__main__":
    key = jax.random.PRNGKey(0)
    kx, kw, kb, kw2, kb2 = jax.random.split(key, 5)

    # Input consistent with torch.randn(2, 4, 4)
    x1 = jax.random.normal(kx, (2, 4, 4), dtype=jnp.float32)

    # Deterministic parameter init (nn.Linear(4, 4) shapes).
    bound = 1.0 / jnp.sqrt(4.0)
    w1 = jax.random.uniform(kw, (4, 4), minval=-bound, maxval=bound, dtype=jnp.float32)
    b1 = jax.random.uniform(kb, (4,), minval=-bound, maxval=bound, dtype=jnp.float32)
    # linear2 parameters exist in the module but are unused in forward; kept for fidelity.
    w2_unused = jax.random.uniform(kw2, (4, 4), minval=-bound, maxval=bound, dtype=jnp.float32)
    b2_unused = jax.random.uniform(kb2, (4,), minval=-bound, maxval=bound, dtype=jnp.float32)

    # Collapsed weight / folded bias computed once (outside the per-call path).
    k_mat, c_flat = prepare_params(w1, b1)
    k_mat = jax.block_until_ready(k_mat)
    c_flat = jax.block_until_ready(c_flat)

    out = double_linear_permute(x1, w1, b1, k_mat, c_flat)
    out = jax.block_until_ready(out)

    # Cross-check against plain JAX reference (matches the PyTorch forward).
    v1 = jnp.einsum("bnd,od->bno", x1, w1) + b1
    v2 = jnp.transpose(v1, (0, 2, 1))
    ref = jnp.einsum("bnd,od->bno", v2, w1) + b1
    assert out.shape == (2, 4, 4)
    assert jnp.allclose(out, ref, atol=1e-5), "mismatch vs reference"

    print("KERNEL_OK")
</pallas_src>

<mosaic_0001>
module attributes {stable_mosaic.version = 11 : i64} {
  func.func @_fused_double_linear_kernel(%arg0: memref<2x16xf32, #tpu.memory_space<vmem>>, %arg1: memref<16x16xf32, #tpu.memory_space<vmem>>, %arg2: memref<1x16xf32, #tpu.memory_space<vmem>>, %arg3: memref<2x16xf32, #tpu.memory_space<vmem>>) attributes {dimension_semantics = [], scalar_prefetch = 0 : i64, scratch_operands = 0 : i64, tpu.core_type = #tpu.core_type<tc>} {
    %c0 = arith.constant 0 : index
    %c0_0 = arith.constant 0 : index
    %0 = vector.load %arg0[%c0, %c0_0] : memref<2x16xf32, #tpu.memory_space<vmem>>, vector<2x16xf32>
    %c0_1 = arith.constant 0 : index
    %c0_2 = arith.constant 0 : index
    %1 = vector.load %arg1[%c0_1, %c0_2] : memref<16x16xf32, #tpu.memory_space<vmem>>, vector<16x16xf32>
    %cst = arith.constant dense<0.000000e+00> : vector<2x16xf32>
    %2 = tpu.matmul %0, %1, %cst {dimension_numbers = #tpu.dot_dimension_numbers<[1], [1], [0], [0], [0, 0, 1, 0], [], []>} : vector<2x16xf32>, vector<16x16xf32>, vector<2x16xf32> -> vector<2x16xf32>
    %c0_3 = arith.constant 0 : index
    %c0_4 = arith.constant 0 : index
    %3 = vector.load %arg2[%c0_3, %c0_4] : memref<1x16xf32, #tpu.memory_space<vmem>>, vector<1x16xf32>
    %4 = vector.broadcast %3 : vector<1x16xf32> to vector<2x16xf32>
    %5 = arith.addf %2, %4 : vector<2x16xf32>
    %c0_5 = arith.constant 0 : index
    %c0_6 = arith.constant 0 : index
    %6 = vector.load %arg3[%c0_5, %c0_6] : memref<2x16xf32, #tpu.memory_space<vmem>>, vector<2x16xf32>
    tpu.vector_store %arg3[%c0_5, %c0_6], %5 {strides = array<i32>} : memref<2x16xf32, #tpu.memory_space<vmem>>, vector<2x16xf32>,
    return
  }
}

</mosaic_0001>

<bundles_post_ra>
// kernel: tpu_custom_call.1
= control target key start
LH: loop header
LB: loop body
LE: loop exit
PB: predicated region body
PF: predicated region fallthrough
CT: control target
= control target key end

     0   :  { %8 = vsyncpa [#allocation3], 0  ;;  %s275_s0 = inlined_call_operand.hbm [shape: f32[2,16], index: 0, kind: input, shape index: {}]   ;;  %s276_s1 = inlined_call_operand.hbm [shape: f32[16,16], index: 1, kind: input, shape index: {}]   ;;  %s277_s2 = inlined_call_operand.vmem [shape: f32[1,16], index: 2, kind: input, shape index: {}]   ;;  %s278_s3 = inlined_call_operand.hbm [shape: f32[2,16], index: 3, kind: output, shape index: {}]  }
   0x1   :  { %9 = vsyncpa [#allocation6], 0 }
   0x2   :  { %10 = vsyncpa [#allocation4], 0  ;;  %s236_s12 = smov [#allocation2]   ;;  %s237_s14 = smov [#allocation5]  }
   0x3   :  { %s17_s13 = sshll.u32 %s236_s12, 4  ;;  %s26_s15 = sshll.u32 %s237_s14, 4  ;;  %s18_s13 = int_to_ptr.vmem [resolvable:$true] %s17_s13  ;;  %s27_s15 = int_to_ptr.vmem [resolvable:$true] %s26_s15 }
   0x4   :  { %s178_s16 = scalar_lea.vmem %s18_s13, 32  ;;  %p183_p1 = scmp.lt.s32.totalorder %s18_s13, %s18_s13 }
   0x5   :  { %p179_p0 = scmp.ne.s32.totalorder %s18_s13, %s178_s16  ;;  %p184_p2 = scmp.lt.s32.totalorder %s178_s16, %s178_s16 }
   0x7   :  { %p185_p3 = por %p184_p2, %p183_p1 }
   0x9   :  { %p186_p4 = pnand %p185_p3, %p179_p0 }
   0xb   :  { %189 = shalt.err (!%p186_p4)
}
   0xc   :  { %20 = dma.hbm_to_vmem [thread:$0]  %s275_s0, 32, %s18_s13, [#allocation3]  }
   0xd   :  { %s198_s19 = scalar_lea.vmem %s27_s15, 256  ;;  %p203_p6 = scmp.lt.s32.totalorder %s27_s15, %s27_s15 }
   0xe   :  { %p199_p5 = scmp.ne.s32.totalorder %s27_s15, %s198_s19  ;;  %p204_p7 = scmp.lt.s32.totalorder %s198_s19, %s198_s19 }
  0x10   :  { %p205_p8 = por %p204_p7, %p203_p6 }
  0x12   :  { %p206_p9 = pnand %p205_p8, %p199_p5 }
  0x14   :  { %209 = shalt.err (!%p206_p9)
}
  0x15   :  { %s238_s20 = smov 128   ;;  %s239_s21 = smov 8  }
  0x16   :  { %32 = dma.hbm_to_vmem [thread:$0]  %s276_s1, 256, %s27_s15, [#allocation6], %s238_s20, %s238_s20, %s239_s21  }
  0x17   :  { %230 = dma.done.wait [#allocation3], 32  }
  0x18   :  { %231 = vsyncadd [#allocation3], 4294967264 }
  0x19   :  { %232 = dma.done.wait [#allocation6], 256  }
  0x1a   :  { %233 = vsyncadd [#allocation6], 4294967040  ;;  %v240_v0 = vmov 0.0   ;;  %vm241_vm0 = vmmov 0   ;;  %vm51_vm1 = vcmask 130048   ;;  %v43_v1 = vld [vmem:[#allocation5 + $0x8] sm:$0xff] }
  0x1b   :  { %156 = vmatprep.subr.mxu0 %v240_v0  ;;  %160 = vmatprep.mubr.msk.f32.mxu0 %vm241_vm0, %v240_v0  ;;  %v42_v2 = vld [vmem:[#allocation5] sm:$0xff]  ;;  %v41_v3 = vld [vmem:[#allocation2] sm:$0x3]  ;;  %s242_s1 = smov [#allocation7]   ;;  %vm131_vm2 = vcmask 123904  }
  0x1c   :  { %157 = vmatpush3.xpose.msk.msra.mxu0 %vm51_vm1, %v43_v1  ;;  %v149_v4 = vld [vmem:[%s277_s2] ss:$0 sm:$0xff]  ;;  %s139_s25 = sshll.u32 %s242_s1, 4  ;;  %s140_s25 = int_to_ptr.vmem [resolvable:$true] %s139_s25 }
  0x1d   :  { %158 = vmatprep.subr.mxu0 %v240_v0  ;;  %s210_s26 = scalar_lea.vmem %s140_s25, 32  ;;  %p215_p11 = scmp.lt.s32.totalorder %s140_s25, %s140_s25 }
  0x1e   :  { %p211_p10 = scmp.ne.s32.totalorder %s140_s25, %s210_s26  ;;  %p216_p12 = scmp.lt.s32.totalorder %s210_s26, %s210_s26 }
  0x20   :  { %159 = vmatpush3.xpose.msk.msra.mxu0 %vm51_vm1, %v42_v2  ;;  %p217_p13 = por %p216_p12, %p215_p11 }
  0x22   :  { %p218_p0 = pnand %p217_p13, %p211_p10 }
  0x23   :  { %161 = vmatmul.mubr.msk.f32.vlgmr.msra.gmra.mxu0 %vm51_vm1, %v41_v3 }
  0xe3   :  { %v127_v5 = vpop.f32.mrf.mxu0 }
  0xe4   :  { %v128_v6 = vadd.f32 %v149_v4, %v127_v5 }
  0xe5   :  { %v162_v7 = vpop.f32.mrf.mxu0 }
  0xe6   :  { %132 = vst.msk [vmem:[#allocation7] sm:$0x3] %vm131_vm2, %v128_v6 }
  0xe7   :  { %221 = shalt.err (!%p218_p0)
}
  0xe8   :  { %142 = dma.vmem_to_hbm [thread:$0]  %s140_s25, 32, %s278_s3, [#allocation4]  }
  0xe9   :  { %234 = dma.done.wait [#allocation4], 32  }
  0xea   :  { %235 = vsyncadd [#allocation4], 4294967264 }
  0xeb   :  { %146 = vsyncpa [#allocation3], 1 }
  0xec   :  { %147 = vsyncpa [#allocation6], 1 }
  0xed   :  { %148 = vsyncpa [#allocation4], 1 }

</bundles_post_ra>
